<compile_context>
chip_gen: v6e
topology: v6e:2x2x1
jax: 0.10.0
libtpu: 0.0.40
codegen_flags: <defaults>
</compile_context>

<pallas_src>
import functools

import jax
import jax.numpy as jnp
from jax.experimental import pallas as pl
from jax.experimental.pallas import tpu as pltpu


def _pick_row_tile(n, hf, hb, budget_bytes=24 * 1024 * 1024):
    """VMEM-aware row tile of the destination-node axis.

    Prefers (a) tiles whose rough per-step VMEM estimate fits the budget,
    (b) an even number of grid steps >= 2 (v7x shards the 'parallel' axis over
    2 TensorCores), (c) the largest such tile (per-step overhead ~0.35 us).
    """
    def vmem_estimate(t):
        invariant = 4 * n * hf * 4                      # g_l^T + g_r (double-buffered alloc)
        streamed = 2 * (hb * t * n * 1                  # int8 adjacency tile
                        + t * hf * 4                    # g_r destination tile
                        + t * hf * 4)                   # output tile
        live = 8 * t * n * 4                            # live (tile, N) f32 intermediates
        return invariant + streamed + live

    candidates = [t for t in (2048, 1024, 512, 256, 128, 64, 32, 16, 8)
                  if n % t == 0 and vmem_estimate(t) <= budget_bytes]
    if not candidates:
        return min(n, 8) if n % 8 == 0 else n
    for t in candidates:                                # largest first
        steps = n // t
        if steps >= 2 and steps % 2 == 0:
            return t
    return candidates[0]


def _proj_kernel(h_ref, w_ref, g_ref):
    # Fused projection: (tile, Din) @ (Din, 2*H*F) -> (tile, 2*H*F), f32 on MXU.
    g_ref[...] = jnp.dot(h_ref[...], w_ref[...], preferred_element_type=jnp.float32)


def _gatv2_kernel(attn_sm_ref, glT_ref, gr_full_ref, gr_tile_ref, adj_ref, out_ref, *,
                  n_heads, n_hidden, negative_slope, adj_heads):
    H, F = n_heads, n_hidden
    neg_slope = jnp.float32(negative_slope)
    neg_big = jnp.float32(-1e30)
    zero = jnp.float32(0.0)

    # Attention-vector scalars, read once from SMEM (shared across all heads).
    a_vals = [attn_sm_ref[f] for f in range(F)]

    # Shared adjacency mask (head dim == 1): convert int8 -> f32 once, reuse per head.
    adj_shared = adj_ref[0].astype(jnp.float32) if adj_heads != H else None

    for hd in range(H):                                     # static unroll, H is small
        base = hd * F
        adj_h = adj_shared if adj_shared is not None else adj_ref[hd].astype(jnp.float32)

        # Pairwise scores accumulated per feature on lane-dense (TI, N) f32 tiles:
        #   e[i, j] = sum_f a[f] * LeakyReLU(g_r[i, hd, f] + g_l[j, hd, f])
        e = None
        for f in range(F):
            col = gr_tile_ref[:, base + f:base + f + 1]     # (TI, 1) destination-node feature
            row = glT_ref[base + f:base + f + 1, :]         # (1, N)  source-node feature (lanes)
            s = col + row                                    # (TI, N) f32
            act = jnp.where(s >= zero, s, neg_slope * s)     # LeakyReLU
            term = a_vals[f] * act
            e = term if e is None else e + term

        # Non-edges -> large negative sentinel (finite: a fully-masked row yields a
        # uniform softmax instead of the torch reference's NaN; benign with self-loops).
        e = jnp.where(adj_h == zero, neg_big, e)

        # Softmax over the neighbor axis j (lane axis).
        m = jnp.max(e, axis=-1, keepdims=True)
        p = jnp.exp(e - m)
        denom = jnp.sum(p, axis=-1, keepdims=True)
        attn = p * pl.reciprocal(denom, approx=True)         # (TI, N) f32

        # TODO(synk): nn.Dropout(p=0.6) on `attn` is stochastic (training only); eval-mode identity.

        # Aggregation (MXU, f32): out[i, f] = sum_j attn[i, j] * g_r[j, hd, f]
        gr_h = gr_full_ref[:, base:base + F]                 # (N, F)
        out_h = jnp.dot(attn, gr_h, preferred_element_type=jnp.float32)   # (TI, F)

        # Direct per-head slice store into the lane-dense (TI, H*F) output tile.
        out_ref[:, base:base + F] = out_h.astype(out_ref.dtype)


def gatv2_forward(h, adj, w_l, w_r, attn_w, *, n_heads, n_hidden,
                  is_concat=True, negative_slope=0.2):
    """Pallas implementation of GraphAttentionV2Layer.forward (eval mode)."""
    N, Din = h.shape
    H, F = n_heads, n_hidden
    HF = H * F

    assert adj.ndim == 3 and adj.shape[2] in (1, H), adj.shape
    Hb = adj.shape[2]

    h32 = h.astype(jnp.float32)
    # torch Linear weights (H*F, Din) -> (Din, H*F); fuse [W_l | W_r].
    w_cat = jnp.concatenate([w_l.T, w_r.T], axis=-1).astype(jnp.float32)   # (Din, 2*H*F)

    tile_i = _pick_row_tile(N, HF, Hb)
    grid = (N // tile_i,)

    # --- Kernel 1: fused projection, computed exactly once (hoisted out of the
    #     attention grid). ---
    g = pl.pallas_call(
        _proj_kernel,
        out_shape=jax.ShapeDtypeStruct((N, 2 * HF), jnp.float32),
        grid=grid,
        in_specs=[
            pl.BlockSpec((tile_i, Din), lambda i: (i, 0)),
            pl.BlockSpec((Din, 2 * HF), lambda i: (0, 0)),
        ],
        out_specs=pl.BlockSpec((tile_i, 2 * HF), lambda i: (i, 0)),
        compiler_params=pltpu.CompilerParams(dimension_semantics=("parallel",)),
    )(h32, w_cat)

    g_l = g[:, :HF]                       # "source"/neighbor-side features (indexed by j)
    g_r = g[:, HF:]                       # "destination"-side features (indexed by i); also aggregated
    g_lT = g_l.T                          # (H*F, N): per-(head,feature) rows are lane-dense over j

    # Adjacency as int8, head-major: the only O(N^2) stream -> 4x less HBM read
    # traffic than an f32 bias, and no extra XLA pass writing an f32 bias to HBM.
    adj_b = jnp.broadcast_to(adj, (N, N, Hb))
    adj_i8 = jnp.moveaxis(adj_b, -1, 0).astype(jnp.int8)                   # (Hb, N, N)

    attn_vec = attn_w.reshape(F).astype(jnp.float32)                       # (F,) -> SMEM

    kernel = functools.partial(
        _gatv2_kernel, n_heads=H, n_hidden=F,
        negative_slope=negative_slope, adj_heads=Hb)

    # --- Kernel 2: attention + softmax + aggregation, row-tiled over destination nodes. ---
    out = pl.pallas_call(
        kernel,
        out_shape=jax.ShapeDtypeStruct((N, HF), jnp.float32),
        grid=grid,
        in_specs=[
            pl.BlockSpec(memory_space=pltpu.MemorySpace.SMEM),       # attention vector (F,)
            pl.BlockSpec((HF, N), lambda i: (0, 0)),                 # g_l^T (grid-invariant)
            pl.BlockSpec((N, HF), lambda i: (0, 0)),                 # g_r, all nodes (grid-invariant)
            pl.BlockSpec((tile_i, HF), lambda i: (i, 0)),            # g_r rows of this dest tile
            pl.BlockSpec((Hb, tile_i, N), lambda i: (0, i, 0)),      # int8 adjacency row tile
        ],
        out_specs=pl.BlockSpec((tile_i, HF), lambda i: (i, 0)),      # lane-dense (N, H*F)
        compiler_params=pltpu.CompilerParams(
            dimension_semantics=("parallel",),
            vmem_limit_bytes=32 * 1024 * 1024),
    )(attn_vec, g_lT, g_r, g_r, adj_i8)

    if is_concat:
        return out                                                    # already (N, H*F)
    return out.reshape(N, H, F).mean(axis=1)


def gatv2_reference(h, adj, w_l, w_r, attn_w, *, n_heads, n_hidden,
                    is_concat=True, negative_slope=0.2):
    """Pure-JAX f32 reference mirroring the PyTorch forward exactly (eval mode)."""
    N = h.shape[0]
    H, F = n_heads, n_hidden
    g_l = (h @ w_l.T).reshape(N, H, F)
    g_r = (h @ w_r.T).reshape(N, H, F)
    g_sum = g_l[None, :, :, :] + g_r[:, None, :, :]              # (N, N, H, F): [i, j]
    act = jnp.where(g_sum >= 0, g_sum, negative_slope * g_sum)
    e = jnp.einsum('ijhf,f->ijh', act, attn_w[0])
    adj_b = jnp.broadcast_to(adj, (N, N, H))
    e = jnp.where(adj_b == 0, -jnp.inf, e)
    a = jax.nn.softmax(e, axis=1)
    attn_res = jnp.einsum('ijh,jhf->ihf', a, g_r)
    if is_concat:
        return attn_res.reshape(N, H * F)
    return attn_res.mean(axis=1)


if __name__ == "__main__":
    # Module config (small, consistent with the torch module's __init__)
    in_features = 32
    out_features = 64
    n_heads = 4
    is_concat = True
    n_hidden = out_features // n_heads      # 16
    N = 64                                  # number of graph nodes (even grid of 2 row tiles)

    key = jax.random.PRNGKey(0)
    k_h, k_wl, k_wr, k_a, k_adj = jax.random.split(key, 5)

    # Deterministic synthetic parameters (shapes match nn.Linear weights)
    h = jax.random.normal(k_h, (N, in_features), dtype=jnp.float32)
    w_l = 0.1 * jax.random.normal(k_wl, (n_heads * n_hidden, in_features), jnp.float32)
    w_r = 0.1 * jax.random.normal(k_wr, (n_heads * n_hidden, in_features), jnp.float32)
    attn_w = 0.1 * jax.random.normal(k_a, (1, n_hidden), jnp.float32)

    # Adjacency with a broadcastable head dim of 1; self-loops so every row has an edge
    adj = (jax.random.uniform(k_adj, (N, N, 1)) < 0.3).astype(jnp.float32)
    adj = jnp.maximum(adj, jnp.eye(N, dtype=jnp.float32)[:, :, None])

    out = gatv2_forward(h, adj, w_l, w_r, attn_w,
                        n_heads=n_heads, n_hidden=n_hidden,
                        is_concat=is_concat, negative_slope=0.2)
    out = jax.block_until_ready(out)

    ref = gatv2_reference(h, adj, w_l, w_r, attn_w,
                          n_heads=n_heads, n_hidden=n_hidden,
                          is_concat=is_concat, negative_slope=0.2)

    assert out.shape == (N, n_heads * n_hidden), out.shape
    # All-f32 math; only the approximate reciprocal deviates from the reference.
    max_err = float(jnp.max(jnp.abs(out - ref)))
    assert jnp.allclose(out, ref, rtol=1e-2, atol=1e-2), max_err
    print("KERNEL_OK")
</pallas_src>

<mosaic_0001>
module attributes {stable_mosaic.version = 11 : i64} {
  func.func @_proj_kernel(%arg0: i32, %arg1: memref<32x32xf32, #tpu.memory_space<vmem>>, %arg2: memref<32x128xf32, #tpu.memory_space<vmem>>, %arg3: memref<32x128xf32, #tpu.memory_space<vmem>>) attributes {dimension_semantics = [#tpu.dimension_semantics<parallel>], iteration_bounds = array<i64: 2>, scalar_prefetch = 0 : i64, scratch_operands = 0 : i64, tpu.core_type = #tpu.core_type<tc>, window_params = [{transform_indices = @transform_0, window_bounds = array<i64: 32, 32>}, {pipeline_mode = #tpu.pipeline_mode<synchronous>, transform_indices = @transform_1, window_bounds = array<i64: 32, 128>}, {transform_indices = @transform_2, window_bounds = array<i64: 32, 128>}]} {
    %c0 = arith.constant 0 : index
    %c0_0 = arith.constant 0 : index
    %0 = vector.load %arg1[%c0, %c0_0] : memref<32x32xf32, #tpu.memory_space<vmem>>, vector<32x32xf32>
    %c0_1 = arith.constant 0 : index
    %c0_2 = arith.constant 0 : index
    %1 = vector.load %arg2[%c0_1, %c0_2] : memref<32x128xf32, #tpu.memory_space<vmem>>, vector<32x128xf32>
    %cst = arith.constant dense<0.000000e+00> : vector<32x128xf32>
    %2 = tpu.matmul %0, %1, %cst {dimension_numbers = #tpu.dot_dimension_numbers<[1], [0], [0], [1], [0, 0, 1, 1], [], []>} : vector<32x32xf32>, vector<32x128xf32>, vector<32x128xf32> -> vector<32x128xf32>
    %c0_3 = arith.constant 0 : index
    %c0_4 = arith.constant 0 : index
    %3 = vector.load %arg3[%c0_3, %c0_4] : memref<32x128xf32, #tpu.memory_space<vmem>>, vector<32x128xf32>
    tpu.vector_store %arg3[%c0_3, %c0_4], %2 {strides = array<i32>} : memref<32x128xf32, #tpu.memory_space<vmem>>, vector<32x128xf32>,
    return
  }
  func.func @transform_0(%arg0: i32) -> (i32, i32) {
    %c0_i32 = arith.constant 0 : i32
    %c0_i32_0 = arith.constant 0 : i32
    return %arg0, %c0_i32 : i32, i32
  }
  func.func @transform_1(%arg0: i32) -> (i32, i32) {
    %c0_i32 = arith.constant 0 : i32
    %c0_i32_0 = arith.constant 0 : i32
    %c0_i32_1 = arith.constant 0 : i32
    return %c0_i32, %c0_i32_0 : i32, i32
  }
  func.func @transform_2(%arg0: i32) -> (i32, i32) {
    %c0_i32 = arith.constant 0 : i32
    %c0_i32_0 = arith.constant 0 : i32
    return %arg0, %c0_i32 : i32, i32
  }
}

</mosaic_0001>

<bundles_post_ra>
// kernel: tpu_custom_call.1
= control target key start
LH: loop header
LB: loop body
LE: loop exit
PB: predicated region body
PF: predicated region fallthrough
CT: control target
= control target key end

     0   :  { %7 = vsyncpa [#allocation3], 0  ;;  %s612_s0 = inlined_call_operand.vmem [shape: f32[64,32], index: 0, kind: input, shape index: {}]   ;;  %s613_s1 = inlined_call_operand.vmem [shape: f32[32,128], index: 1, kind: input, shape index: {}]   ;;  %s614_s2 = inlined_call_operand.hbm [shape: f32[64,128], index: 2, kind: output, shape index: {}]  }
   0x1   :  { %9 = vsyncpa [#allocation3 + $0x1], 0  ;;  %s499_s9 = smov 0   ;;  %s501_s10 = smov 0  }
   0x2   :  { %s503_s11 = smov 0   ;;  %s505_s12 = smov 0  }
   0x3 LB: > { %s520_s13 = sadd.s32 4294967295, %s479_s12   ;;  %s331_s14 = sadd.s32 4294967294, %s479_s12   ;;  %s479_s12 = sphi %s505_s12, %s620_s12   ;;  %s475_s11 = sphi %s503_s11, %s619_s11   ;;  %s471_s10 = sphi %s501_s10, %s618_s10   ;;  %s467_s9 = sphi %s499_s9, %s617_s9  }
   0x4   : > { %s524_s15 = sadd.s32 1, %s479_s12   ;;  %s69_s16 = sadd.s32 1, %s475_s11 }
   0x5   : > { %s66_s17 = ssub.s32 %s479_s12, %s524_s15  ;;  %p79_p0 = scmp.ne.s32.totalorder %s475_s11, %s471_s10 }
   0x6   : > { %p67_p1 = scmp.eq.s32.totalorder %s66_s17, 0  ;;  %p80_p2 = scmp.eq.s32.totalorder %s520_s13, 1 }
   0x7   : > { %p85_p3 = scmp.ne.s32.totalorder %s471_s10, %s467_s9  ;;  %p86_p4 = scmp.eq.s32.totalorder %s331_s14, 1 }
   0x8   : > { %s535_s18 = scalar_select %p67_p1, %s475_s11, %s69_s16  }
   0x9   : > { %p537_p5 = por %p80_p2, %p79_p0  ;;  %p541_p6 = por %p86_p4, %p85_p3 }
   0xa   : > { %p334_p7 = scmp.ge.s32.totalorder %s479_s12, 1  ;;  %p116_p8 = scmp.lt.s32.totalorder %s479_s12, 3 }
   0xc   : > { %p117_p9 = pnand %p334_p7, %p116_p8 }
   0xd   : > { %s336_s25 = sshll.u32 (!%p117_p9), %s520_s13, 2  ;;  %s135_s6 = sand.u32 (!%p117_p9), 1, %s471_s10  }
   0xe   : > { %120 = sbr.rel (%p117_p9) target bundleno = 238 (0xee), region = 28  ;;  %p139_p10 = scmp.lt.s32.totalorder (!%p117_p9), %s336_s25, 7 }
   0xf   : > { %s335_s7 = sshll.u32 (!%p117_p9), %s135_s6, 5  ;;  %s347_s16 = sshll.u32 (!%p117_p9), %s520_s13, 9 }
  0x10   : > { %s137_s8 = scalar_lea.vmem (!%p117_p9), [#allocation2], %s335_s7  ;;  %s570_s22 = scalar_lea.hbm (!%p117_p9), %s614_s2, %s347_s16 }
  0x11   : > { %s269_s14 = sshll.u32 (!%p117_p9), %s137_s8, 4  ;;  %s572_s23 = scalar_lea.sflag (!%p117_p9), [#allocation3], %s135_s6  ;;  %s565_s14 = int_to_ptr.vmem [resolvable:$true] %s269_s14 }
  0x12   : > { %s419_s13 = scalar_lea.vmem (!%p117_p9), %s565_s14, 512  ;;  %s481_s24 = smov (!%p117_p9), [#allocation2]  }
  0x13   : > { %v152_v0 = vld [vmem:[%s613_s1 + $0x18] sm:$0xff]  ;;  %v151_v1 = vld [vmem:[%s613_s1 + $0x10] sm:$0xff]  ;;  %v150_v2 = vld [vmem:[%s613_s1 + $0x8] sm:$0xff]  ;;  %s622_s25 = smov (!%p139_p10, %s336_s25), 7  ;;  %vm153_vm0 = vcmask 261120   ;;  %p420_p11 = scmp.ne.s32.totalorder %s565_s14, %s419_s13 }
  0x14   : > { %356 = vmatprep.subr.mxu0 %v152_v0  ;;  %370 = vmatprep.subr.mxu1 %v152_v0  ;;  %v149_v3 = vld [vmem:[%s613_s1] sm:$0xff]  ;;  %s337_s30 = sshll.u32 %s622_s25, 3  ;;  %s423_s25 = sshll.u32 %s481_s24, 4  ;;  %s424_s25 = int_to_ptr.vmem [resolvable:$false] %s423_s25 }
  0x15   : > { %357 = vmatpush3.msra.mxu0 %v152_v0  ;;  %374 = vmatpush3.msra.mxu1 %v152_v0  ;;  %s142_s5 = scalar_lea.vmem %s612_s0, %s337_s30  ;;  %p421_p12 = pnand %p420_p11, %p537_p5 }
  0x16   : > { %358 = vmatprep.subr.mxu0 %v151_v1  ;;  %371 = vmatprep.subr.mxu1 %v151_v1  ;;  %v145_v4 = vld [vmem:[%s142_s5] sm:$0xff]  ;;  %v147_v5 = vld [vmem:[%s142_s5 + $0x10] sm:$0xff]  ;;  %v146_v6 = vld [vmem:[%s142_s5 + $0x8] sm:$0xff]  ;;  %s425_s26 = scalar_lea.vmem %s424_s25, 1024  ;;  %p426_p0 = scmp.lt.s32.totalorder %s565_s14, %s424_s25 }
  0x17   : > { %359 = vmatpush3.msra.mxu0 %v151_v1  ;;  %375 = vmatpush3.msra.mxu1 %v151_v1  ;;  %v148_v7 = vld [vmem:[%s142_s5 + $0x18] sm:$0xff]  ;;  %p422_p13 = pneg %p421_p12  ;;  %p427_p1 = scmp.lt.s32.totalorder %s425_s26, %s419_s13 }
  0x18   : > { %360 = vmatprep.subr.mxu0 %v150_v2  ;;  %372 = vmatprep.subr.mxu1 %v150_v2 }
  0x19   : > { %361 = vmatpush3.msra.mxu0 %v150_v2  ;;  %376 = vmatpush3.msra.mxu1 %v150_v2  ;;  %p428_p2 = por %p427_p1, %p426_p0 }
  0x1a   : > { %362 = vmatprep.subr.mxu0 %v149_v3  ;;  %373 = vmatprep.subr.mxu1 %v149_v3 }
  0x1b   : > { %363 = vmatpush3.msra.mxu0 %v149_v3  ;;  %377 = vmatpush3.msra.mxu1 %v149_v3  ;;  %p429_p3 = pnand %p428_p2, %p422_p13 }
  0x1c   : > { %364 = vmatprep.mubr.msk.f32.mxu0 %vm153_vm0, %v145_v4  ;;  %367 = vmatprep.mubr.msk.f32.mxu1 %vm153_vm0, %v147_v5 }
  0x1d   : > { %365 = vmatmul.mubr.msk.f32.vlgmr.msra.gmra.mxu0 %vm153_vm0, %v146_v6  ;;  %368 = vmatmul.mubr.msk.f32.vlgmr.msra.gmra.mxu1 %vm153_vm0, %v148_v7 }
  0xdd   : > { %v366_v8 = vpop.f32.mrf.mxu0  ;;  %v369_v9 = vpop.f32.mrf.mxu1 }
  0xde   : > { %252 = vst [vmem:[%s137_s8 + $0x8] sm:$0xff] %v366_v8  ;;  %254 = vst [vmem:[%s137_s8 + $0x18] sm:$0xff] %v369_v9 }
  0xdf   : > { %v232_v10 = vpop.f32.mrf.mxu0  ;;  %v242_v11 = vpop.f32.mrf.mxu1 }
  0xe0   : > { %251 = vst [vmem:[%s137_s8] sm:$0xff] %v232_v10  ;;  %253 = vst [vmem:[%s137_s8 + $0x10] sm:$0xff] %v242_v11 }
  0xe1   : > { %432 = shalt.err (!%p429_p3)
}
  0xe2   : > { %s433_s27 = scalar_lea.hbm %s570_s22, 512  ;;  %s437_s30 = scalar_lea.hbm %s614_s2, 1024 }
  0xe3   : > { %p434_p4 = scmp.ne.s32.totalorder %s570_s22, %s433_s27  ;;  %p438_p9 = scmp.lt.s32.totalorder %s570_s22, %s614_s2 }
  0xe4   : > { %p439_p10 = scmp.lt.s32.totalorder %s437_s30, %s433_s27 }
  0xe5   : > { %p435_p7 = pnand %p434_p4, %p537_p5 }
  0xe6   : > { %p440_p11 = por %p439_p10, %p438_p9 }
  0xe7   : > { %p436_p8 = pneg %p435_p7 }
  0xe9   : > { %p441_p12 = pnand %p440_p11, %p436_p8 }
  0xeb   : > { %444 = shalt.err (!%p441_p12)
}
  0xec   : > { %s482_s5 = smov 128   ;;  %s483_s6 = smov 8  }
  0xed   : > { %378 = dma.vmem_to_hbm [thread:$0]  (%p537_p5), %s565_s14, 512, %s570_s22, %s572_s23, %s482_s5, %s482_s5, %s483_s6  }
  0xee PF: > { %p384_p13 = scmp.ge.s32.totalorder %s479_s12, 2  ;;  %s284_s7 = sand.u32 1, %s467_s9  }
  0xef   : > { %s285_s8 = scalar_lea.sflag [#allocation3], %s284_s7 }
  0xf0   : > { %p381_p0 = pnand %p384_p13, %p541_p6 }
  0xf2   : > { %p382_p1 = pneg %p381_p0 }
  0xf4   : > { %462 = dma.done.wait (%p382_p1), %s285_s8, 512  }
  0xf5   : > { %464 = vsyncadd (%p382_p1), %s285_s8, 4294966784  ;;  %p12_p2 = scmp.ge.s32.totalorder %s524_s15, 4   ;;  %s617_s9 = smov %s471_s10 }
  0xf6   : > { %s618_s10 = smov %s475_s11  ;;  %s619_s11 = smov %s535_s18 }
  0xf7   : > { %s620_s12 = smov %s524_s15  ;;  %14 = sbr.rel (!%p12_p2) target bundleno = 3 (0x3), region = 63 }
  0xfc   :  { %290 = vsyncpa [#allocation3], 1 }
  0xfd   :  { %292 = vsyncpa [#allocation3 + $0x1], 1 }

</bundles_post_ra>
